<compile_context>
chip_gen: v6e
topology: v6e:2x2x1
jax: 0.10.0
libtpu: 0.0.40
codegen_flags: <defaults>
</compile_context>

<pallas_src>
import functools

import numpy as np

import jax
import jax.numpy as jnp
from jax.experimental import pallas as pl
from jax.experimental.pallas import tpu as pltpu


def _pair_loss_sum_kernel(a_ref, b_ref, out_ref, *, margin, tb, n_pos, n_pairs):
    i = pl.program_id(0)

    @pl.when(i == 0)
    def _():
        out_ref[...] = jnp.zeros_like(out_ref)

    a = a_ref[...].astype(jnp.float32)          # (TB, D)
    b = b_ref[...].astype(jnp.float32)          # (TB, D)

    diff = a - b
    # Single fused cross-lane reduction (keepdims keeps a (TB, 1) layout).
    d2 = jnp.sum(diff * diff, axis=1, keepdims=True)          # (TB, 1)

    pos_loss = d2
    dist = jnp.sqrt(d2)                                        # EUP
    hinge = jnp.maximum(margin - dist, 0.0)
    neg_loss = hinge * hinge

    # Global pair index of every row in this block; pairs are ordered
    # [positives | negatives | padding], thresholds are trace-time constants.
    idx = i * tb + jax.lax.broadcasted_iota(jnp.int32, d2.shape, 0)  # (TB, 1)
    loss = jnp.where(idx < n_pos, pos_loss, neg_loss)
    loss = jnp.where(idx < n_pairs, loss, 0.0)                 # zero the padding

    # Accumulate into the VMEM-resident (1,1) output block.
    out_ref[...] = out_ref[...] + jnp.sum(loss, axis=(0, 1), keepdims=True)


def _all_pairs_selector(labels):
    """All-pairs emulation of pair_selector.get_pairs(embeddings, target)."""
    labels = np.asarray(labels)
    n = labels.shape[0]
    ii, jj = np.triu_indices(n, k=1)
    same = labels[ii] == labels[jj]
    positive_pairs = np.stack([ii[same], jj[same]], axis=1)
    negative_pairs = np.stack([ii[~same], jj[~same]], axis=1)
    return positive_pairs, negative_pairs


def _round_up(x, m):
    return ((x + m - 1) // m) * m


def online_contrastive_loss(embeddings, target, margin):
    """Pallas TPU implementation of OnlineContrastiveLoss.forward."""
    emb = jnp.squeeze(embeddings)
    if emb.ndim == 1:
        emb = emb[None, :]
    assert emb.ndim == 2, "expected (B, D) embeddings after squeeze"
    B, D = emb.shape

    pos_pairs, neg_pairs = _all_pairs_selector(target)
    n_pos, n_neg = int(pos_pairs.shape[0]), int(neg_pairs.shape[0])
    n_pairs = n_pos + n_neg
    if n_pairs == 0:
        return jnp.float32(0.0)

    # Ordered layout: [positives | negatives | padding].
    idx_a = np.concatenate([pos_pairs[:, 0], neg_pairs[:, 0]]).astype(np.int32)
    idx_b = np.concatenate([pos_pairs[:, 1], neg_pairs[:, 1]]).astype(np.int32)

    # Tile over pairs: big enough to amortize per-step overhead (~0.35us),
    # small enough that 2 inputs x 2 pipeline buffers stay well inside the
    # default scoped-VMEM limit on v5e/v6e/v7x (<= 4 MiB per (TB, D) f32 buf).
    max_elems_per_buf = (4 * 1024 * 1024) // 4
    tb_cap = max(8, (max_elems_per_buf // max(D, 1)) // 8 * 8)
    TB = max(8, min(512, tb_cap, _round_up(n_pairs, 8)))
    p_pad = _round_up(n_pairs, TB)

    # Gather pair endpoints in the wrapper; padded rows are zeros and get
    # masked to exactly 0 loss inside the kernel.
    a = jnp.zeros((p_pad, D), emb.dtype).at[:n_pairs].set(emb[idx_a])
    b = jnp.zeros((p_pad, D), emb.dtype).at[:n_pairs].set(emb[idx_b])

    kernel = functools.partial(
        _pair_loss_sum_kernel,
        margin=float(margin), tb=TB, n_pos=n_pos, n_pairs=n_pairs,
    )
    total = pl.pallas_call(
        kernel,
        out_shape=jax.ShapeDtypeStruct((1, 1), jnp.float32),
        grid=(p_pad // TB,),
        in_specs=[
            pl.BlockSpec((TB, D), lambda i: (i, 0)),
            pl.BlockSpec((TB, D), lambda i: (i, 0)),
        ],
        # Same block index every step -> output stays resident in VMEM and is
        # written back to HBM once (reduction axis).
        out_specs=pl.BlockSpec((1, 1), lambda i: (0, 0)),
        compiler_params=pltpu.CompilerParams(
            dimension_semantics=("arbitrary",),
        ),
    )(a, b)

    return total[0, 0] / jnp.float32(n_pairs)


if __name__ == "__main__":
    key = jax.random.PRNGKey(0)

    B, D = 16, 128  # lane-dense feature dim
    embeddings = jax.random.normal(key, (B, 1, D), dtype=jnp.float32)
    labels = jnp.arange(B, dtype=jnp.int32) % 4  # 4 classes -> pos & neg pairs
    margin = 1.0

    loss = online_contrastive_loss(embeddings, labels, margin)
    loss = jax.block_until_ready(loss)

    # Plain-JAX reference of OnlineContrastiveLoss.forward.
    emb_ref = jnp.squeeze(embeddings)
    pos, neg = _all_pairs_selector(np.asarray(labels))
    pos_loss_ref = jnp.sum((emb_ref[pos[:, 0]] - emb_ref[pos[:, 1]]) ** 2, axis=1)
    neg_dist_ref = jnp.sqrt(
        jnp.sum((emb_ref[neg[:, 0]] - emb_ref[neg[:, 1]]) ** 2, axis=1)
    )
    neg_loss_ref = jnp.maximum(margin - neg_dist_ref, 0.0) ** 2
    ref = jnp.mean(jnp.concatenate([pos_loss_ref, neg_loss_ref], axis=0))

    assert jnp.allclose(loss, ref, rtol=1e-5, atol=1e-5), (loss, ref)
    print("KERNEL_OK")
</pallas_src>

<mosaic_0001>
module attributes {stable_mosaic.version = 11 : i64} {
  func.func @_pair_loss_sum_kernel(%arg0: i32, %arg1: memref<120x128xf32, #tpu.memory_space<vmem>>, %arg2: memref<120x128xf32, #tpu.memory_space<vmem>>, %arg3: memref<1x1xf32, #tpu.memory_space<vmem>>) attributes {dimension_semantics = [#tpu.dimension_semantics<arbitrary>], iteration_bounds = array<i64: 1>, scalar_prefetch = 0 : i64, scratch_operands = 0 : i64, tpu.core_type = #tpu.core_type<tc>, window_params = [{transform_indices = @transform_0, window_bounds = array<i64: 120, 128>}, {transform_indices = @transform_1, window_bounds = array<i64: 120, 128>}, {pipeline_mode = #tpu.pipeline_mode<synchronous>, transform_indices = @transform_2, window_bounds = array<i64: 1, 1>}]} {
    %c0_i32 = arith.constant 0 : i32
    %0 = arith.cmpi eq, %arg0, %c0_i32 : i32
    %1 = arith.extui %0 : i1 to i32
    %c0_i32_0 = arith.constant 0 : i32
    %2 = arith.cmpi ne, %1, %c0_i32_0 : i32
    scf.if %2 {
      %cst_13 = arith.constant 0.000000e+00 : f32
      %34 = vector.broadcast %cst_13 : f32 to vector<1x1xf32>
      %c0_14 = arith.constant 0 : index
      %c0_15 = arith.constant 0 : index
      %35 = vector.load %arg3[%c0_14, %c0_15] : memref<1x1xf32, #tpu.memory_space<vmem>>, vector<1x1xf32>
      tpu.vector_store %arg3[%c0_14, %c0_15], %34 {strides = array<i32>} : memref<1x1xf32, #tpu.memory_space<vmem>>, vector<1x1xf32>,
    } else {
    }
    %c0 = arith.constant 0 : index
    %c0_1 = arith.constant 0 : index
    %3 = vector.load %arg1[%c0, %c0_1] : memref<120x128xf32, #tpu.memory_space<vmem>>, vector<120x128xf32>
    %c0_2 = arith.constant 0 : index
    %c0_3 = arith.constant 0 : index
    %4 = vector.load %arg2[%c0_2, %c0_3] : memref<120x128xf32, #tpu.memory_space<vmem>>, vector<120x128xf32>
    %5 = arith.subf %3, %4 : vector<120x128xf32>
    %6 = arith.mulf %5, %5 : vector<120x128xf32>
    %cst = arith.constant dense<0.000000e+00> : vector<120xf32>
    %7 = vector.multi_reduction <add>, %6, %cst [1] : vector<120x128xf32> to vector<120xf32>
    %8 = vector.shape_cast %7 : vector<120xf32> to vector<120x1xf32>
    %9 = math.sqrt %8 : vector<120x1xf32>
    %cst_4 = arith.constant 1.000000e+00 : f32
    %10 = vector.broadcast %cst_4 : f32 to vector<120x1xf32>
    %11 = arith.subf %10, %9 : vector<120x1xf32>
    %cst_5 = arith.constant 0.000000e+00 : f32
    %12 = vector.broadcast %cst_5 : f32 to vector<120x1xf32>
    %13 = arith.maximumf %11, %12 : vector<120x1xf32>
    %14 = arith.mulf %13, %13 : vector<120x1xf32>
    %c120_i32 = arith.constant 120 : i32
    %15 = arith.muli %arg0, %c120_i32 : i32
    %16 = tpu.iota {dimensions = array<i32: 0>} : vector<120x1xi32>
    %17 = vector.broadcast %15 : i32 to vector<120x1xi32>
    %18 = arith.addi %17, %16 : vector<120x1xi32>
    %c24_i32 = arith.constant 24 : i32
    %19 = vector.broadcast %c24_i32 : i32 to vector<120x1xi32>
    %20 = arith.cmpi slt, %18, %19 : vector<120x1xi32>
    %21 = arith.select %20, %8, %14 : vector<120x1xi1>, vector<120x1xf32>
    %c120_i32_6 = arith.constant 120 : i32
    %22 = vector.broadcast %c120_i32_6 : i32 to vector<120x1xi32>
    %23 = arith.cmpi slt, %18, %22 : vector<120x1xi32>
    %cst_7 = arith.constant 0.000000e+00 : f32
    %24 = vector.broadcast %cst_7 : f32 to vector<120x1xf32>
    %25 = arith.select %23, %21, %24 : vector<120x1xi1>, vector<120x1xf32>
    %c0_8 = arith.constant 0 : index
    %c0_9 = arith.constant 0 : index
    %26 = vector.load %arg3[%c0_8, %c0_9] : memref<1x1xf32, #tpu.memory_space<vmem>>, vector<1x1xf32>
    %27 = vector.shape_cast %25 : vector<120x1xf32> to vector<1x120x1xf32>
    %cst_10 = arith.constant dense<0.000000e+00> : vector<1xf32>
    %28 = vector.multi_reduction <add>, %27, %cst_10 [1, 2] : vector<1x120x1xf32> to vector<1xf32>
    %29 = vector.shape_cast %28 : vector<1xf32> to vector<1x1x1xf32>
    %30 = vector.extract %29[0, 0, 0] : f32 from vector<1x1x1xf32>
    %31 = vector.broadcast %30 : f32 to vector<1x1xf32>
    %32 = arith.addf %26, %31 : vector<1x1xf32>
    %c0_11 = arith.constant 0 : index
    %c0_12 = arith.constant 0 : index
    %33 = vector.load %arg3[%c0_11, %c0_12] : memref<1x1xf32, #tpu.memory_space<vmem>>, vector<1x1xf32>
    tpu.vector_store %arg3[%c0_11, %c0_12], %32 {strides = array<i32>} : memref<1x1xf32, #tpu.memory_space<vmem>>, vector<1x1xf32>,
    return
  }
  func.func @transform_0(%arg0: i32) -> (i32, i32) {
    %c0_i32 = arith.constant 0 : i32
    %c0_i32_0 = arith.constant 0 : i32
    return %arg0, %c0_i32 : i32, i32
  }
  func.func @transform_1(%arg0: i32) -> (i32, i32) {
    %c0_i32 = arith.constant 0 : i32
    %c0_i32_0 = arith.constant 0 : i32
    return %arg0, %c0_i32 : i32, i32
  }
  func.func @transform_2(%arg0: i32) -> (i32, i32) {
    %c0_i32 = arith.constant 0 : i32
    %c0_i32_0 = arith.constant 0 : i32
    %c0_i32_1 = arith.constant 0 : i32
    return %c0_i32, %c0_i32_0 : i32, i32
  }
}

</mosaic_0001>

<bundles_post_ra>
// kernel: tpu_custom_call.1
= control target key start
LH: loop header
LB: loop body
LE: loop exit
PB: predicated region body
PF: predicated region fallthrough
CT: control target
= control target key end

     0   :  { %7 = vsyncpa [#allocation3], 0  ;;  %s679_s0 = inlined_call_operand.hbm [shape: f32[120,128], index: 0, kind: input, shape index: {}]   ;;  %s680_s1 = inlined_call_operand.hbm [shape: f32[120,128], index: 1, kind: input, shape index: {}]   ;;  %s681_s2 = inlined_call_operand.hbm [shape: f32[1,1], index: 2, kind: output, shape index: {}]  }
   0x1   :  { %8 = vsyncpa [#allocation6], 0 }
   0x2   :  { %9 = vsyncpa [#allocation4], 0  ;;  %s537_s9 = smov [#allocation2]  }
   0x3   :  { %s15_s10 = sshll.u32 %s537_s9, 4  ;;  %s16_s10 = int_to_ptr.vmem [resolvable:$true] %s15_s10 }
   0x4   :  { %s479_s11 = scalar_lea.vmem %s16_s10, 1920  ;;  %p484_p1 = scmp.lt.s32.totalorder %s16_s10, %s16_s10 }
   0x5   :  { %p480_p0 = scmp.ne.s32.totalorder %s16_s10, %s479_s11  ;;  %p485_p2 = scmp.lt.s32.totalorder %s479_s11, %s479_s11 }
   0x7   :  { %p486_p3 = por %p485_p2, %p484_p1 }
   0x9   :  { %p487_p4 = pnand %p486_p3, %p480_p0 }
   0xb   :  { %490 = shalt.err (!%p487_p4)
}
   0xc   :  { %s538_s12 = smov 128   ;;  %s539_s13 = smov 8  }
   0xd   :  { %21 = dma.hbm_to_vmem [thread:$0]  %s679_s0, 1920, %s16_s10, [#allocation3], %s538_s12, %s538_s12, %s539_s13  }
   0xe   :  { %s540_s16 = smov [#allocation5]  }
   0xf   :  { %s27_s17 = sshll.u32 %s540_s16, 4  ;;  %s28_s17 = int_to_ptr.vmem [resolvable:$true] %s27_s17 }
  0x10   :  { %s499_s18 = scalar_lea.vmem %s28_s17, 1920  ;;  %p504_p6 = scmp.lt.s32.totalorder %s28_s17, %s28_s17 }
  0x11   :  { %p500_p5 = scmp.ne.s32.totalorder %s28_s17, %s499_s18  ;;  %p505_p7 = scmp.lt.s32.totalorder %s499_s18, %s499_s18 }
  0x13   :  { %p506_p8 = por %p505_p7, %p504_p6 }
  0x15   :  { %p507_p9 = pnand %p506_p8, %p500_p5 }
  0x17   :  { %510 = shalt.err (!%p507_p9)
}
  0x18   :  { %33 = dma.hbm_to_vmem [thread:$0]  %s680_s1, 1920, %s28_s17, [#allocation6], %s538_s12, %s538_s12, %s539_s13  }
  0x19   :  { %531 = dma.done.wait [#allocation3], 1920  }
  0x1a   :  { %532 = vsyncadd [#allocation3], 4294965376 }
  0x1b   :  { %533 = dma.done.wait [#allocation6], 1920  }
  0x1c   :  { %534 = vsyncadd [#allocation6], 4294965376  ;;  %v51_v0 = vld [vmem:[#allocation2 + $0x28] sm:$0xff]  ;;  %v66_v1 = vld [vmem:[#allocation5 + $0x28] sm:$0xff]  ;;  %vm380_vm0 = vcmask 7168   ;;  %s542_s0 = smov [#allocation7]  }
  0x1d   :  { %v49_v2 = vld [vmem:[#allocation2 + $0x18] sm:$0xff]  ;;  %v81_v3 = vsub.f32 %v51_v0, %v66_v1  ;;  %v64_v4 = vld [vmem:[#allocation5 + $0x18] sm:$0xff]  ;;  %v67_v6 = vld [vmem:[#allocation5 + $0x30] sm:$0xff]  ;;  %s429_s1 = sshll.u32 %s542_s0, 4  ;;  %s430_s1 = int_to_ptr.vmem [resolvable:$true] %s429_s1 }
  0x1e   :  { %v52_v5 = vld [vmem:[#allocation2 + $0x30] sm:$0xff]  ;;  %v79_v7 = vsub.f32 %v49_v2, %v64_v4  ;;  %v50_v9 = vld [vmem:[#allocation2 + $0x20] sm:$0xff]  ;;  %v65_v10 = vld [vmem:[#allocation5 + $0x20] sm:$0xff]  ;;  %s511_s22 = scalar_lea.vmem %s430_s1, 16  ;;  %s515_s23 = scalar_lea.vmem %s430_s1, 32 }
  0x1f   :  { %v82_v8 = vsub.f32 %v52_v5, %v67_v6  ;;  %v54_v11 = vld [vmem:[#allocation2 + $0x40] sm:$0xff]  ;;  %v96_v12 = vmul.f32 %v81_v3, %v81_v3  ;;  %v80_v13 = vsub.f32 %v50_v9, %v65_v10  ;;  %v69_v14 = vld [vmem:[#allocation5 + $0x40] sm:$0xff]  ;;  %v68_v16 = vld [vmem:[#allocation5 + $0x38] sm:$0xff]  ;;  %p512_p10 = scmp.ne.s32.totalorder %s430_s1, %s511_s22  ;;  %p516_p11 = scmp.lt.s32.totalorder %s430_s1, %s430_s1 }
  0x20   :  { %v53_v15 = vld [vmem:[#allocation2 + $0x38] sm:$0xff]  ;;  %v94_v17 = vmul.f32 %v79_v7, %v79_v7  ;;  %v84_v19 = vsub.f32 %v54_v11, %v69_v14  ;;  %v56_v22 = vld [vmem:[#allocation2 + $0x50] sm:$0xff]  ;;  %v71_v23 = vld [vmem:[#allocation5 + $0x50] sm:$0xff]  ;;  %p517_p12 = scmp.lt.s32.totalorder %s515_s23, %s511_s22 }
  0x21   :  { %116 = vadd.xlane.f32.xlu1 %v96_v12  ;;  %v97_v18 = vmul.f32 %v82_v8, %v82_v8  ;;  %v95_v20 = vmul.f32 %v80_v13, %v80_v13  ;;  %v83_v21 = vsub.f32 %v53_v15, %v68_v16  ;;  %v55_v24 = vld [vmem:[#allocation2 + $0x48] sm:$0xff]  ;;  %v70_v25 = vld [vmem:[#allocation5 + $0x48] sm:$0xff]  ;;  %v86_v27 = vsub.f32 %v56_v22, %v71_v23  ;;  %v73_v31 = vld [vmem:[#allocation5 + $0x60] sm:$0xff] }
  0x22   :  { %112 = vadd.xlane.f32.xlu0 %v94_v17  ;;  %v99_v26 = vmul.f32 %v84_v19, %v84_v19  ;;  %v85_v29 = vsub.f32 %v55_v24, %v70_v25  ;;  %v58_v30 = vld [vmem:[#allocation2 + $0x60] sm:$0xff]  ;;  %v57_v32 = vld [vmem:[#allocation2 + $0x58] sm:$0xff]  ;;  %v72_v33 = vld [vmem:[#allocation5 + $0x58] sm:$0xff]  ;;  %p518_p13 = por %p517_p12, %p516_p11 }
  0x23   :  { %v98_v28 = vmul.f32 %v83_v21, %v83_v21  ;;  %v101_v34 = vmul.f32 %v86_v27, %v86_v27  ;;  %v88_v35 = vsub.f32 %v58_v30, %v73_v31  ;;  %v87_v37 = vsub.f32 %v57_v32, %v72_v33  ;;  %v47_v38 = vld [vmem:[#allocation2 + $0x8] sm:$0xff]  ;;  %v62_v39 = vld [vmem:[#allocation5 + $0x8] sm:$0xff]  ;;  %v61_v41 = vld [vmem:[#allocation5] sm:$0xff] }
  0x24   :  { %v100_v36 = vmul.f32 %v85_v29, %v85_v29  ;;  %v46_v40 = vld [vmem:[#allocation2] sm:$0xff]  ;;  %v77_v43 = vsub.f32 %v47_v38, %v62_v39  ;;  %v48_v46 = vld [vmem:[#allocation2 + $0x10] sm:$0xff]  ;;  %v63_v47 = vld [vmem:[#allocation5 + $0x10] sm:$0xff]  ;;  %p519_p0 = pnand %p518_p13, %p512_p10 }
  0x25   :  { %118 = vadd.xlane.f32.xlu1 %v97_v18  ;;  %v103_v42 = vmul.f32 %v88_v35, %v88_v35  ;;  %v102_v44 = vmul.f32 %v87_v37, %v87_v37  ;;  %v76_v45 = vsub.f32 %v46_v40, %v61_v41  ;;  %v59_v48 = vld [vmem:[#allocation2 + $0x68] sm:$0xff]  ;;  %v74_v49 = vld [vmem:[#allocation5 + $0x68] sm:$0xff]  ;;  %v78_v51 = vsub.f32 %v48_v46, %v63_v47  ;;  %v60_v54 = vld [vmem:[#allocation2 + $0x70] sm:$0xff] }
  0x26   :  { %114 = vadd.xlane.f32.xlu0 %v95_v20  ;;  %v92_v50 = vmul.f32 %v77_v43, %v77_v43  ;;  %v89_v53 = vsub.f32 %v59_v48, %v74_v49  ;;  %v75_v55 = vld [vmem:[#allocation5 + $0x70] sm:$0xff] }
  0x27   :  { %v91_v52 = vmul.f32 %v76_v45, %v76_v45  ;;  %v93_v56 = vmul.f32 %v78_v51, %v78_v51  ;;  %v90_v58 = vsub.f32 %v60_v54, %v75_v55 }
  0x28   :  { %v104_v57 = vmul.f32 %v89_v53, %v89_v53 }
  0x29   :  { %122 = vadd.xlane.f32.xlu1 %v99_v26  ;;  %v105_v59 = vmul.f32 %v90_v58, %v90_v58 }
  0x2a   :  { %120 = vadd.xlane.f32.xlu0 %v98_v28 }
  0x2d   :  { %126 = vadd.xlane.f32.xlu1 %v101_v34 }
  0x2e   :  { %124 = vadd.xlane.f32.xlu0 %v100_v36 }
  0x31   :  { %130 = vadd.xlane.f32.xlu1 %v103_v42 }
  0x32   :  { %128 = vadd.xlane.f32.xlu0 %v102_v44 }
  0x35   :  { %108 = vadd.xlane.f32.xlu1 %v92_v50 }
  0x36   :  { %106 = vadd.xlane.f32.xlu0 %v91_v52 }
  0x39   :  { %110 = vadd.xlane.f32.xlu1 %v93_v56 }
  0x3a   :  { %132 = vadd.xlane.f32.xlu0 %v104_v57 }
  0x3e   :  { %134 = vadd.xlane.f32.xlu0 %v105_v59 }
  0xaa   :  { %v117_v60 = vpop.xlane.xlu1 %116 }
  0xab   :  { %447 = vrsqrt.f32 %v117_v60  ;;  %v113_v61 = vpop.xlane.xlu0 %112  ;;  %vm173_vm1 = vcmp.eq.f32.partialorder %v117_v60, inf  ;;  %vm175_vm2 = vcmp.eq.f32.partialorder %v117_v60, 0.0  ;;  %v176_v5 = vand.u32 2147483648, %v117_v60 }
  0xac   :  { %449 = vrsqrt.f32 %v113_v61  ;;  %vm159_vm3 = vcmp.eq.f32.partialorder %v113_v61, inf  ;;  %v162_v8 = vand.u32 2147483648, %v113_v61  ;;  %vm161_vm4 = vcmp.eq.f32.partialorder %v113_v61, 0.0 }
  0xae   :  { %v119_v62 = vpop.xlane.xlu1 %118 }
  0xaf   :  { %451 = vrsqrt.f32 %v119_v62  ;;  %v115_v63 = vpop.xlane.xlu0 %114  ;;  %vm180_vm5 = vcmp.eq.f32.partialorder %v119_v62, inf  ;;  %vm182_vm6 = vcmp.eq.f32.partialorder %v119_v62, 0.0  ;;  %v183_v10 = vand.u32 2147483648, %v119_v62 }
  0xb0   :  { %453 = vrsqrt.f32 %v115_v63  ;;  %vm166_vm7 = vcmp.eq.f32.partialorder %v115_v63, inf  ;;  %vm168_vm8 = vcmp.eq.f32.partialorder %v115_v63, 0.0  ;;  %v169_v15 = vand.u32 2147483648, %v115_v63 }
  0xb2   :  { %v564_v0 = vpop.xlane.xlu1 %122 }
  0xb3   :  { %455 = vrsqrt.f32 %v564_v0  ;;  %v567_v1 = vpop.xlane.xlu0 %120  ;;  %vm194_vm9 = vcmp.eq.f32.partialorder %v564_v0, inf  ;;  %vm196_vm10 = vcmp.eq.f32.partialorder %v564_v0, 0.0  ;;  %v197_v18 = vand.u32 2147483648, %v564_v0 }
  0xb4   :  { %457 = vrsqrt.f32 %v567_v1  ;;  %vm187_vm11 = vcmp.eq.f32.partialorder %v567_v1, inf  ;;  %vm189_vm12 = vcmp.eq.f32.partialorder %v567_v1, 0.0  ;;  %v190_v25 = vand.u32 2147483648, %v567_v1 }
  0xb6   :  { %v570_v2 = vpop.xlane.xlu1 %126 }
  0xb7   :  { %459 = vrsqrt.f32 %v570_v2  ;;  %v573_v3 = vpop.xlane.xlu0 %124  ;;  %v211_v31 = vand.u32 2147483648, %v570_v2  ;;  %vm208_vm14 = vcmp.eq.f32.partialorder %v570_v2, inf }
  0xb8   :  { %v448_v4 = vpop.eup %447  ;;  %461 = vrsqrt.f32 %v573_v3  ;;  %vm201_vm13 = vcmp.eq.f32.partialorder %v573_v3, inf  ;;  %vm203_vm15 = vcmp.eq.f32.partialorder %v573_v3, 0.0  ;;  %v204_v43 = vand.u32 2147483648, %v573_v3 }
  0xb9   :  { %v450_v6 = vpop.eup %449  ;;  %v172_v7 = vmul.f32 %v448_v4, %v117_v60 }
  0xba   :  { %v158_v9 = vmul.f32 %v450_v6, %v113_v61  ;;  %v576_v11 = vpop.xlane.xlu1 %130 }
  0xbb   :  { %v174_v12 = vsel %vm173_vm1, %v117_v60, %v172_v7  ;;  %463 = vrsqrt.f32 %v576_v11  ;;  %v579_v13 = vpop.xlane.xlu0 %128  ;;  %vm210_vm1 = vcmp.eq.f32.partialorder %v570_v2, 0.0 }
  0xbc   :  { %v452_v14 = vpop.eup %451  ;;  %465 = vrsqrt.f32 %v579_v13  ;;  %v160_v19 = vsel %vm159_vm3, %v113_v61, %v158_v9  ;;  %v177_v20 = vsel %vm175_vm2, %v176_v5, %v174_v12  ;;  %vm222_vm2 = vcmp.eq.f32.partialorder %v576_v11, inf }
  0xbd   :  { %v454_v16 = vpop.eup %453  ;;  %v179_v17 = vmul.f32 %v452_v14, %v119_v62  ;;  %v163_v23 = vsel %vm161_vm4, %v162_v8, %v160_v19  ;;  %v246_v28 = vsub.f32 1.0, %v177_v20  ;;  %vm215_vm3 = vcmp.eq.f32.partialorder %v579_v13, inf }
  0xbe   :  { %v165_v21 = vmul.f32 %v454_v16, %v115_v63  ;;  %v109_v22 = vpop.xlane.xlu1 %108  ;;  %v244_v27 = vsub.f32 1.0, %v163_v23  ;;  %vm217_vm4 = vcmp.eq.f32.partialorder %v579_v13, 0.0 }
  0xbf   :  { %v181_v24 = vsel %vm180_vm5, %v119_v62, %v179_v17  ;;  %v107_v26 = vpop.xlane.xlu0 %106  ;;  %v382_v35 = vsel %vm380_vm0, %v109_v22, 0.0  ;;  %v261_v45 = vmax.f32 %v246_v28, 0.0  ;;  %vm224_vm5 = vcmp.eq.f32.partialorder %v576_v11, 0.0 }
  0xc0   :  { %v456_v29 = vpop.eup %455  ;;  %v167_v30 = vsel %vm166_vm7, %v115_v63, %v165_v21  ;;  %v184_v32 = vsel %vm182_vm6, %v183_v10, %v181_v24  ;;  %v381_v38 = vsel %vm380_vm0, %v107_v26, 0.0  ;;  %v259_v40 = vmax.f32 %v244_v27, 0.0 }
  0xc1   :  { %v458_v33 = vpop.eup %457  ;;  %v193_v34 = vmul.f32 %v456_v29, %v564_v0  ;;  %v170_v36 = vsel %vm168_vm8, %v169_v15, %v167_v30  ;;  %v247_v44 = vsub.f32 1.0, %v184_v32  ;;  %v383_v54 = vadd.f32 %v382_v35, %v381_v38 }
  0xc2   :  { %v186_v37 = vmul.f32 %v458_v33, %v567_v1  ;;  %v245_v39 = vsub.f32 1.0, %v170_v36  ;;  %v111_v41 = vpop.xlane.xlu1 %110  ;;  %v274_v51 = vmul.f32 %v259_v40, %v259_v40  ;;  %v276_v62 = vmul.f32 %v261_v45, %v261_v45 }
  0xc3   :  { %v195_v42 = vsel %vm194_vm9, %v564_v0, %v193_v34  ;;  %v607_v46 = vpop.xlane.xlu0 %132  ;;  %v384_v55 = vsel %vm380_vm0, %v111_v41, 0.0  ;;  %v262_v61 = vmax.f32 %v247_v44, 0.0  ;;  %v225_v27 = vand.u32 2147483648, %v576_v11 }
  0xc4   :  { %v460_v47 = vpop.eup %459  ;;  %v198_v48 = vsel %vm196_vm10, %v197_v18, %v195_v42  ;;  %v188_v49 = vsel %vm187_vm11, %v567_v1, %v186_v37  ;;  %v260_v50 = vmax.f32 %v245_v39, 0.0  ;;  %v386_v4 = vsel %vm380_vm0, %v274_v51, 0.0 }
  0xc5   :  { %v462_v52 = vpop.eup %461  ;;  %v191_v53 = vsel %vm189_vm12, %v190_v25, %v188_v49  ;;  %v207_v57 = vmul.f32 %v460_v47, %v570_v2  ;;  %v249_v60 = vsub.f32 1.0, %v198_v48  ;;  %v385_v5 = vadd.f32 %v384_v55, %v383_v54 }
  0xc6   :  { %v248_v56 = vsub.f32 1.0, %v191_v53  ;;  %v200_v58 = vmul.f32 %v462_v52, %v573_v3  ;;  %v275_v59 = vmul.f32 %v260_v50, %v260_v50  ;;  %467 = vrsqrt.f32 %v607_v46 }
  0xc7   :  { %v627_v6 = vpop.xlane.xlu0 %134  ;;  %v209_v12 = vsel %vm208_vm14, %v570_v2, %v207_v57  ;;  %v387_v16 = vadd.f32 %v386_v4, %v385_v5  ;;  %v264_v17 = vmax.f32 %v249_v60, 0.0  ;;  %v218_v18 = vand.u32 2147483648, %v579_v13 }
  0xc8   :  { %v464_v63 = vpop.eup %463  ;;  %v263_v0 = vmax.f32 %v248_v56, 0.0  ;;  %v202_v1 = vsel %vm201_vm13, %v573_v3, %v200_v58  ;;  %v388_v10 = vsel %vm380_vm0, %v275_v59, 0.0  ;;  %v277_v19 = vmul.f32 %v262_v61, %v262_v61 }
  0xc9   :  { %v466_v7 = vpop.eup %465  ;;  %v205_v8 = vsel %vm203_vm15, %v204_v43, %v202_v1  ;;  %v221_v9 = vmul.f32 %v464_v63, %v576_v11  ;;  %469 = vrsqrt.f32 %v627_v6  ;;  %v390_v21 = vsel %vm380_vm0, %v276_v62, 0.0 }
  0xca   :  { %v250_v14 = vsub.f32 1.0, %v205_v8  ;;  %v214_v15 = vmul.f32 %v466_v7, %v579_v13  ;;  %v278_v20 = vmul.f32 %v263_v0, %v263_v0  ;;  %v389_v22 = vadd.f32 %v388_v10, %v387_v16 }
  0xcb   :  { %v223_v24 = vsel %vm222_vm2, %v576_v11, %v221_v9  ;;  %v212_v25 = vsel %vm210_vm1, %v211_v31, %v209_v12  ;;  %v279_v29 = vmul.f32 %v264_v17, %v264_v17  ;;  %v392_v30 = vsel %vm380_vm0, %v277_v19, 0.0 }
  0xcc   :  { %v216_v3 = vsel %vm215_vm3, %v579_v13, %v214_v15  ;;  %v265_v23 = vmax.f32 %v250_v14, 0.0  ;;  %v391_v28 = vadd.f32 %v390_v21, %v389_v22  ;;  %v251_v32 = vsub.f32 1.0, %v212_v25 }
  0xcd   :  { %v219_v26 = vsel %vm217_vm4, %v218_v18, %v216_v3  ;;  %v226_v35 = vsel %vm224_vm5, %v225_v27, %v223_v24  ;;  %v394_v36 = vsel %vm380_vm0, %v278_v20, 0.0  ;;  %v396_v40 = vsel %vm380_vm0, %v279_v29, 0.0 }
  0xce   :  { %v252_v33 = vsub.f32 1.0, %v219_v26  ;;  %v393_v34 = vadd.f32 %v392_v30, %v391_v28  ;;  %v266_v37 = vmax.f32 %v251_v32, 0.0  ;;  %v280_v2 = vmul.f32 %v265_v23, %v265_v23 }
  0xcf   :  { %v253_v38 = vsub.f32 1.0, %v226_v35  ;;  %vm229_vm6 = vcmp.eq.f32.partialorder %v607_v46, inf  ;;  %v232_v50 = vand.u32 2147483648, %v607_v46  ;;  %vm231_vm7 = vcmp.eq.f32.partialorder %v607_v46, 0.0 }
  0xd0   :  { %v395_v31 = vadd.f32 %v394_v36, %v393_v34  ;;  %v267_v13 = vmax.f32 %v252_v33, 0.0  ;;  %v281_v39 = vmul.f32 %v266_v37, %v266_v37  ;;  %v398_v11 = vsel %vm380_vm0, %v280_v2, 0.0 }
  0xd1   :  { %v268_v45 = vmax.f32 %v253_v38, 0.0  ;;  %vm236_vm8 = vcmp.eq.f32.partialorder %v627_v6, inf  ;;  %v239_v54 = vand.u32 2147483648, %v627_v6  ;;  %vm238_vm9 = vcmp.eq.f32.partialorder %v627_v6, 0.0 }
  0xd2   :  { %v397_v41 = vadd.f32 %v396_v40, %v395_v31  ;;  %v282_v47 = vmul.f32 %v267_v13, %v267_v13  ;;  %v400_v48 = vsel %vm380_vm0, %v281_v39, 0.0  ;;  %vm44_vm10 = vcmask 0  }
  0xd3   :  { %v468_v42 = vpop.eup %467  ;;  %v283_v58 = vmul.f32 %v268_v45, %v268_v45  ;;  %v541_v10 = vmov 0.0  }
  0xd4   :  { %v399_v43 = vadd.f32 %v398_v11, %v397_v41  ;;  %v228_v44 = vmul.f32 %v468_v42, %v607_v46  ;;  %v402_v59 = vsel %vm380_vm0, %v282_v47, 0.0  ;;  %45 = vst.msk [vmem:[#allocation7] sm:$0x1] %vm44_vm10, %v541_v10 }
  0xd6   :  { %v470_v49 = vpop.eup %469  ;;  %v401_v51 = vadd.f32 %v400_v48, %v399_v43  ;;  %v230_v53 = vsel %vm229_vm6, %v607_v46, %v228_v44  ;;  %v404_v46 = vsel %vm380_vm0, %v283_v58, 0.0 }
  0xd7   :  { %v235_v52 = vmul.f32 %v470_v49, %v627_v6  ;;  %v233_v55 = vsel %vm231_vm7, %v232_v50, %v230_v53 }
  0xd8   :  { %v254_v57 = vsub.f32 1.0, %v233_v55  ;;  %v403_v61 = vadd.f32 %v402_v59, %v401_v51 }
  0xd9   :  { %v237_v56 = vsel %vm236_vm8, %v627_v6, %v235_v52 }
  0xda   :  { %v240_v60 = vsel %vm238_vm9, %v239_v54, %v237_v56  ;;  %v269_v63 = vmax.f32 %v254_v57, 0.0  ;;  %v405_v4 = vadd.f32 %v404_v46, %v403_v61 }
  0xdb   :  { %v255_v62 = vsub.f32 1.0, %v240_v60  ;;  %v379_v3 = vld [vmem:[#allocation7] sm:$0x1] }
  0xdc   :  { %v284_v1 = vmul.f32 %v269_v63, %v269_v63 }
  0xdd   :  { %v270_v0 = vmax.f32 %v255_v62, 0.0 }
  0xde   :  { %v406_v7 = vsel %vm380_vm0, %v284_v1, 0.0 }
  0xdf   :  { %v285_v5 = vmul.f32 %v270_v0, %v270_v0  ;;  %v407_v8 = vadd.f32 %v406_v7, %v405_v4 }
  0xe1   :  { %v408_v9 = vsel %vm380_vm0, %v285_v5, 0.0 }
  0xe2   :  { %v409_v6 = vadd.f32 %v408_v9, %v407_v8 }
  0xe4   :  { %410 = vadd.xlane.f32.xlu1 %v409_v6 }
 0x16d   :  { %v411_v12 = vpop.xlane.xlu1 %410 }
 0x16e   :  { %v412_v14 = vrot.slane %v411_v12, 4 }
 0x170   :  { %v413_v15 = vadd.f32 %v412_v14, %v411_v12 }
 0x172   :  { %v414_v16 = vrot.slane %v413_v15, 2 }
 0x174   :  { %v415_v17 = vadd.f32 %v414_v16, %v413_v15 }
 0x176   :  { %v416_v18 = vrot.slane %v415_v17, 1 }
 0x178   :  { %v417_v19 = vadd.f32 %v416_v18, %v415_v17 }
 0x17a   :  { %439 = vpush %v417_v19 }
 0x1ab   :  { %s440_s21 = spop %439 }
 0x1ac   :  { %v419_v20 = vstv %s440_s21 }
 0x1ad   :  { %v420_v21 = vadd.f32 %v419_v20, %v379_v3 }
 0x1af   :  { %422 = vst.msk [vmem:[#allocation7] sm:$0x1] %vm44_vm10, %v420_v21 }
 0x1b0   :  { %522 = shalt.err (!%p519_p0)
}
 0x1b1   :  { %432 = dma.vmem_to_hbm [thread:$0]  %s430_s1, 16, %s681_s2, [#allocation4]  }
 0x1b2   :  { %535 = dma.done.wait [#allocation4], 16  }
 0x1b3   :  { %536 = vsyncadd [#allocation4], 4294967280 }
 0x1b4   :  { %436 = vsyncpa [#allocation3], 1 }
 0x1b5   :  { %437 = vsyncpa [#allocation6], 1 }
 0x1b6   :  { %438 = vsyncpa [#allocation4], 1 }

</bundles_post_ra>
